<compile_context>
chip_gen: v6e
topology: v6e:2x2x1
jax: 0.10.0
libtpu: 0.0.40
codegen_flags: <defaults>
</compile_context>

<pallas_src>
import math

import jax
import jax.numpy as jnp
from jax.experimental import pallas as pl
from jax.experimental.pallas import tpu as pltpu


def _fused_conv1x1_tanh_conv1x1_kernel(x_ref, w1t_ref, b1_ref, w2t_ref, b2_ref, o_ref):
    # x_ref:   (nb, C_in, tp)   nb batch images x tp pixels (pixels = lanes)
    # w1t_ref: (C_hid, C_in)    resident
    # b1_ref:  (C_hid, 1)       resident
    # w2t_ref: (1, C_hid)       resident
    # b2_ref:  (1, 1)           resident
    # o_ref:   (nb, 1, tp)      lane-dense output block
    nb = x_ref.shape[0]  # static
    w1t = w1t_ref[...]
    b1 = b1_ref[...]
    w2t = w2t_ref[...]
    b2 = b2_ref[...]
    for b in range(nb):  # static unrolled loop over batch sub-tile
        xb = x_ref[b]                                            # (C_in, tp)
        v1 = jnp.dot(w1t, xb, preferred_element_type=jnp.float32) + b1   # (C_hid, tp)
        v2 = jnp.tanh(v1)                                        # EUP; fine on v5e/v6e (mem-bound)
        out = jnp.dot(w2t, v2, preferred_element_type=jnp.float32) + b2  # (1, tp)
        o_ref[b] = out.astype(o_ref.dtype)


def model_tanh_forward(x, w1t, b1, w2t, b2, *, tp_max=2048, nb_max=8):
    """Fused 1x1-conv -> tanh -> 1x1-conv.

    x:   (N, C_in, H, W) float32 (NCHW, matching PyTorch)
    w1t: (C_hid, C_in)   == PyTorch conv.weight[:, :, 0, 0]
    b1:  (C_hid,)
    w2t: (1, C_hid)      == PyTorch conv2.weight[:, :, 0, 0]
    b2:  (1,)
    Returns (N, 1, H, W) float32.
    """
    N, C_in, H, W = x.shape
    C_hid = w1t.shape[0]
    P = H * W

    # Free reshape: keep channels in sublanes, pixels in lanes. No transpose.
    xr = x.reshape(N, C_in, P)

    # Batch sub-tile: largest divisor of N not exceeding nb_max (no batch padding).
    nb = max(d for d in range(1, min(nb_max, N) + 1) if N % d == 0)

    # Pixel tile: whole spatial extent if it fits (block last dim == full dim is
    # always legal), otherwise a 128-multiple tile with padding of the last tile.
    if P <= tp_max:
        tp, Pp = P, P
    else:
        tp = tp_max  # multiple of 128
        Pp = pl.cdiv(P, tp) * tp
        if Pp != P:
            xr = jnp.pad(xr, ((0, 0), (0, 0), (0, Pp - P)))

    b1_2d = b1.reshape(C_hid, 1).astype(jnp.float32)
    b2_2d = b2.reshape(1, 1).astype(jnp.float32)

    out = pl.pallas_call(
        _fused_conv1x1_tanh_conv1x1_kernel,
        out_shape=jax.ShapeDtypeStruct((N, 1, Pp), jnp.float32),
        grid_spec=pltpu.PrefetchScalarGridSpec(
            num_scalar_prefetch=0,
            grid=(N // nb, Pp // tp),
            in_specs=[
                pl.BlockSpec((nb, C_in, tp), lambda i, j: (i, 0, j)),
                pl.BlockSpec((C_hid, C_in), lambda i, j: (0, 0)),
                pl.BlockSpec((C_hid, 1), lambda i, j: (0, 0)),
                pl.BlockSpec((1, C_hid), lambda i, j: (0, 0)),
                pl.BlockSpec((1, 1), lambda i, j: (0, 0)),
            ],
            out_specs=pl.BlockSpec((nb, 1, tp), lambda i, j: (i, 0, j)),
        ),
        compiler_params=pltpu.CompilerParams(
            dimension_semantics=("parallel", "parallel"),
        ),
    )(xr, w1t.astype(jnp.float32), b1_2d, w2t.astype(jnp.float32), b2_2d)

    if Pp != P:
        out = out[:, :, :P]
    return out.reshape(N, 1, H, W)


def _reference(x, w1t, b1, w2t, b2):
    """Plain-JAX reference: 1x1 conv == channel matmul."""
    N, C_in, H, W = x.shape
    C_hid = w1t.shape[0]
    xr = x.reshape(N, C_in, H * W)
    v1 = jnp.einsum("hk,nkp->nhp", w1t, xr) + b1.reshape(1, C_hid, 1)
    v2 = jnp.tanh(v1)
    o = jnp.einsum("oh,nhp->nop", w2t, v2) + b2.reshape(1, 1, 1)
    return o.reshape(N, 1, H, W)


def _init_params(key, c_in=30, c_hid=30):
    """Kaiming-uniform-style init matching PyTorch Conv2d(k=1) fan-in bounds."""
    k1, k2, k3, k4 = jax.random.split(key, 4)
    bound1 = 1.0 / math.sqrt(c_in)
    w1t = jax.random.uniform(k1, (c_hid, c_in), jnp.float32, -bound1, bound1)
    b1 = jax.random.uniform(k2, (c_hid,), jnp.float32, -bound1, bound1)
    bound2 = 1.0 / math.sqrt(c_hid)
    w2t = jax.random.uniform(k3, (1, c_hid), jnp.float32, -bound2, bound2)
    b2 = jax.random.uniform(k4, (1,), jnp.float32, -bound2, bound2)
    return w1t, b1, w2t, b2


if __name__ == "__main__":
    key = jax.random.PRNGKey(0)
    kx, kp, kx2 = jax.random.split(key, 3)

    # Small shapes consistent with the module (in-channels must be 30).
    N, C, H, W = 2, 30, 16, 16
    x = jax.random.normal(kx, (N, C, H, W), dtype=jnp.float32)
    w1t, b1, w2t, b2 = _init_params(kp, c_in=C, c_hid=30)

    out = model_tanh_forward(x, w1t, b1, w2t, b2)
    out = jax.block_until_ready(out)
    ref = _reference(x, w1t, b1, w2t, b2)
    assert out.shape == (N, 1, H, W)
    assert jnp.allclose(out, ref, atol=1e-4, rtol=1e-4)

    # Second check with non-lane-aligned spatial size (exercises tp == H*W path).
    x2 = jax.random.normal(kx2, (N, C, 9, 7), dtype=jnp.float32)
    out2 = jax.block_until_ready(model_tanh_forward(x2, w1t, b1, w2t, b2))
    ref2 = _reference(x2, w1t, b1, w2t, b2)
    assert out2.shape == (N, 1, 9, 7)
    assert jnp.allclose(out2, ref2, atol=1e-4, rtol=1e-4)

    print("KERNEL_OK")
</pallas_src>

<mosaic_0001>
module attributes {stable_mosaic.version = 11 : i64} {
  func.func @_fused_conv1x1_tanh_conv1x1_kernel(%arg0: i32, %arg1: i32, %arg2: memref<2x30x256xf32, #tpu.memory_space<vmem>>, %arg3: memref<30x30xf32, #tpu.memory_space<vmem>>, %arg4: memref<30x1xf32, #tpu.memory_space<vmem>>, %arg5: memref<1x30xf32, #tpu.memory_space<vmem>>, %arg6: memref<1x1xf32, #tpu.memory_space<vmem>>, %arg7: memref<2x1x256xf32, #tpu.memory_space<vmem>>) attributes {dimension_semantics = [#tpu.dimension_semantics<parallel>, #tpu.dimension_semantics<parallel>], iteration_bounds = array<i64: 1, 1>, scalar_prefetch = 0 : i64, scratch_operands = 0 : i64, tpu.core_type = #tpu.core_type<tc>, window_params = [{transform_indices = @transform_0, window_bounds = array<i64: 2, 30, 256>}, {pipeline_mode = #tpu.pipeline_mode<synchronous>, transform_indices = @transform_1, window_bounds = array<i64: 30, 30>}, {pipeline_mode = #tpu.pipeline_mode<synchronous>, transform_indices = @transform_2, window_bounds = array<i64: 30, 1>}, {pipeline_mode = #tpu.pipeline_mode<synchronous>, transform_indices = @transform_3, window_bounds = array<i64: 1, 30>}, {pipeline_mode = #tpu.pipeline_mode<synchronous>, transform_indices = @transform_4, window_bounds = array<i64: 1, 1>}, {transform_indices = @transform_5, window_bounds = array<i64: 2, 1, 256>}]} {
    %c0 = arith.constant 0 : index
    %c0_0 = arith.constant 0 : index
    %0 = vector.load %arg3[%c0, %c0_0] : memref<30x30xf32, #tpu.memory_space<vmem>>, vector<30x30xf32>
    %c0_1 = arith.constant 0 : index
    %c0_2 = arith.constant 0 : index
    %1 = vector.load %arg4[%c0_1, %c0_2] : memref<30x1xf32, #tpu.memory_space<vmem>>, vector<30x1xf32>
    %c0_3 = arith.constant 0 : index
    %c0_4 = arith.constant 0 : index
    %2 = vector.load %arg5[%c0_3, %c0_4] : memref<1x30xf32, #tpu.memory_space<vmem>>, vector<1x30xf32>
    %c0_5 = arith.constant 0 : index
    %c0_6 = arith.constant 0 : index
    %3 = vector.load %arg6[%c0_5, %c0_6] : memref<1x1xf32, #tpu.memory_space<vmem>>, vector<1x1xf32>
    %c0_7 = arith.constant 0 : index
    %c0_8 = arith.constant 0 : index
    %c0_9 = arith.constant 0 : index
    %4 = vector.load %arg2[%c0_7, %c0_8, %c0_9] : memref<2x30x256xf32, #tpu.memory_space<vmem>>, vector<1x30x256xf32>
    %5 = vector.shape_cast %4 : vector<1x30x256xf32> to vector<30x256xf32>
    %cst = arith.constant dense<0.000000e+00> : vector<30x256xf32>
    %6 = tpu.matmul %0, %5, %cst {dimension_numbers = #tpu.dot_dimension_numbers<[1], [0], [0], [1], [0, 0, 1, 1], [], []>} : vector<30x30xf32>, vector<30x256xf32>, vector<30x256xf32> -> vector<30x256xf32>
    %7 = vector.broadcast %1 : vector<30x1xf32> to vector<30x256xf32>
    %8 = arith.addf %6, %7 : vector<30x256xf32>
    %9 = math.tanh %8 : vector<30x256xf32>
    %cst_10 = arith.constant dense<0.000000e+00> : vector<1x256xf32>
    %10 = tpu.matmul %2, %9, %cst_10 {dimension_numbers = #tpu.dot_dimension_numbers<[1], [0], [0], [1], [0, 0, 1, 1], [], []>} : vector<1x30xf32>, vector<30x256xf32>, vector<1x256xf32> -> vector<1x256xf32>
    %11 = vector.broadcast %3 : vector<1x1xf32> to vector<1x256xf32>
    %12 = arith.addf %10, %11 : vector<1x256xf32>
    %c0_11 = arith.constant 0 : index
    %c0_12 = arith.constant 0 : index
    %c0_13 = arith.constant 0 : index
    %13 = vector.load %arg7[%c0_11, %c0_12, %c0_13] : memref<2x1x256xf32, #tpu.memory_space<vmem>>, vector<1x1x256xf32>
    %14 = vector.shape_cast %13 : vector<1x1x256xf32> to vector<1x256xf32>
    %15 = vector.shape_cast %12 : vector<1x256xf32> to vector<1x1x256xf32>
    tpu.vector_store %arg7[%c0_11, %c0_12, %c0_13], %15 {strides = array<i32>} : memref<2x1x256xf32, #tpu.memory_space<vmem>>, vector<1x1x256xf32>,
    %c1 = arith.constant 1 : index
    %c0_14 = arith.constant 0 : index
    %c0_15 = arith.constant 0 : index
    %16 = vector.load %arg2[%c1, %c0_14, %c0_15] : memref<2x30x256xf32, #tpu.memory_space<vmem>>, vector<1x30x256xf32>
    %17 = vector.shape_cast %16 : vector<1x30x256xf32> to vector<30x256xf32>
    %cst_16 = arith.constant dense<0.000000e+00> : vector<30x256xf32>
    %18 = tpu.matmul %0, %17, %cst_16 {dimension_numbers = #tpu.dot_dimension_numbers<[1], [0], [0], [1], [0, 0, 1, 1], [], []>} : vector<30x30xf32>, vector<30x256xf32>, vector<30x256xf32> -> vector<30x256xf32>
    %19 = vector.broadcast %1 : vector<30x1xf32> to vector<30x256xf32>
    %20 = arith.addf %18, %19 : vector<30x256xf32>
    %21 = math.tanh %20 : vector<30x256xf32>
    %cst_17 = arith.constant dense<0.000000e+00> : vector<1x256xf32>
    %22 = tpu.matmul %2, %21, %cst_17 {dimension_numbers = #tpu.dot_dimension_numbers<[1], [0], [0], [1], [0, 0, 1, 1], [], []>} : vector<1x30xf32>, vector<30x256xf32>, vector<1x256xf32> -> vector<1x256xf32>
    %23 = vector.broadcast %3 : vector<1x1xf32> to vector<1x256xf32>
    %24 = arith.addf %22, %23 : vector<1x256xf32>
    %c1_18 = arith.constant 1 : index
    %c0_19 = arith.constant 0 : index
    %c0_20 = arith.constant 0 : index
    %25 = vector.load %arg7[%c1_18, %c0_19, %c0_20] : memref<2x1x256xf32, #tpu.memory_space<vmem>>, vector<1x1x256xf32>
    %26 = vector.shape_cast %25 : vector<1x1x256xf32> to vector<1x256xf32>
    %27 = vector.shape_cast %24 : vector<1x256xf32> to vector<1x1x256xf32>
    tpu.vector_store %arg7[%c1_18, %c0_19, %c0_20], %27 {strides = array<i32>} : memref<2x1x256xf32, #tpu.memory_space<vmem>>, vector<1x1x256xf32>,
    return
  }
  func.func @transform_0(%arg0: i32, %arg1: i32) -> (i32, i32, i32) {
    %c0_i32 = arith.constant 0 : i32
    %c0_i32_0 = arith.constant 0 : i32
    return %arg0, %c0_i32, %arg1 : i32, i32, i32
  }
  func.func @transform_1(%arg0: i32, %arg1: i32) -> (i32, i32) {
    %c0_i32 = arith.constant 0 : i32
    %c0_i32_0 = arith.constant 0 : i32
    %c0_i32_1 = arith.constant 0 : i32
    return %c0_i32, %c0_i32_0 : i32, i32
  }
  func.func @transform_2(%arg0: i32, %arg1: i32) -> (i32, i32) {
    %c0_i32 = arith.constant 0 : i32
    %c0_i32_0 = arith.constant 0 : i32
    %c0_i32_1 = arith.constant 0 : i32
    return %c0_i32, %c0_i32_0 : i32, i32
  }
  func.func @transform_3(%arg0: i32, %arg1: i32) -> (i32, i32) {
    %c0_i32 = arith.constant 0 : i32
    %c0_i32_0 = arith.constant 0 : i32
    %c0_i32_1 = arith.constant 0 : i32
    return %c0_i32, %c0_i32_0 : i32, i32
  }
  func.func @transform_4(%arg0: i32, %arg1: i32) -> (i32, i32) {
    %c0_i32 = arith.constant 0 : i32
    %c0_i32_0 = arith.constant 0 : i32
    %c0_i32_1 = arith.constant 0 : i32
    return %c0_i32, %c0_i32_0 : i32, i32
  }
  func.func @transform_5(%arg0: i32, %arg1: i32) -> (i32, i32, i32) {
    %c0_i32 = arith.constant 0 : i32
    %c0_i32_0 = arith.constant 0 : i32
    return %arg0, %c0_i32, %arg1 : i32, i32, i32
  }
}

</mosaic_0001>

<bundles_post_ra>
// kernel: tpu_custom_call.1
= control target key start
LH: loop header
LB: loop body
LE: loop exit
PB: predicated region body
PF: predicated region fallthrough
CT: control target
= control target key end

     0   :  { %s800_s0 = inlined_call_operand.vmem [shape: f32[2,30,256], index: 0, kind: input, shape index: {}]   ;;  %s801_s1 = inlined_call_operand.vmem [shape: f32[30,30], index: 1, kind: input, shape index: {}]   ;;  %s802_s2 = inlined_call_operand.vmem [shape: f32[30,1], index: 2, kind: input, shape index: {}]   ;;  %s803_s3 = inlined_call_operand.vmem [shape: f32[1,30], index: 3, kind: input, shape index: {}]   ;;  %s804_s4 = inlined_call_operand.<no memory space> [shape: f32[1,1], index: 4, kind: input, shape index: {}]   ;;  %s805_s5 = inlined_call_operand.hbm [shape: f32[2,1,256], index: 5, kind: output, shape index: {}]  }
   0x1   :  { %v10_v0 = vstv %s804_s4 }
   0x2   :  { %11 = vst [vmem:[#allocation2] sm:$0x1] %v10_v0 }
   0x3   :  { %v40_v1 = vld [vmem:[%s800_s0 + $0x38] sm:$0x3f]  ;;  %vm74_vm0 = vcmask 1045504   ;;  %v39_v2 = vld [vmem:[%s800_s0 + $0x30] sm:$0x3f]  ;;  %v38_v3 = vld [vmem:[%s800_s0 + $0x28] sm:$0xff] }
   0x4   :  { %515 = vmatprep.subr.msk.mxu0 %vm74_vm0, %v40_v1  ;;  %v37_v4 = vld [vmem:[%s800_s0 + $0x20] sm:$0xff]  ;;  %v36_v5 = vld [vmem:[%s800_s0 + $0x18] sm:$0xff]  ;;  %v603_v6 = vmov 0.0   ;;  %v35_v7 = vld [vmem:[%s800_s0 + $0x10] sm:$0xff]  ;;  %v604_v8 = vmov 0  }
   0x5   :  { %516 = vmatpush1.msk.msra.mxu0 %vm74_vm0, %v39_v2  ;;  %145 = vmatprep.mubr.f32.mxu0 %v603_v6  ;;  %v34_v9 = vld [vmem:[%s800_s0 + $0x8] sm:$0xff]  ;;  %v30_v11 = vld [vmem:[%s802_s2 + $0x18] sm:$0x3f]  ;;  %v33_v12 = vld [vmem:[%s800_s0] sm:$0xff] }
   0x6   :  { %107 = vmatprep.subr.mxu0 %v38_v3  ;;  %548 = vset.pattern.permute.xlu1 %v604_v8  ;;  %v28_v10 = vld [vmem:[%s802_s2 + $0x8] sm:$0xff] }
   0x7   :  { %108 = vmatpush1.msra.mxu0 %v37_v4  ;;  %547 = vset.pattern.permute.xlu0 %v604_v8 }
   0x8   :  { %109 = vmatprep.subr.mxu0 %v36_v5  ;;  %48 = vperm.xlu1 %548, %v28_v10  }
   0x9   :  { %12 = vsyncpa [#allocation4], 0  ;;  %110 = vmatpush1.msra.mxu0 %v35_v7  ;;  %v678_v13 = vld [vmem:[%s801_s1] sm:$0xff]  ;;  %vm61_vm1 = vcmask 244736   ;;  %58 = vperm.xlu0 %547, %v30_v11   ;;  %v29_v15 = vld [vmem:[%s802_s2 + $0x10] sm:$0xff]  ;;  %v183_v57 = vlaneseq }
   0xa   :  { %v27_v14 = vld [vmem:[%s802_s2] sm:$0xff]  ;;  %111 = vmatprep.subr.mxu0 %v34_v9  ;;  %260 = vmatprep.mubr.f32.mxu1 %v603_v6  ;;  %v693_v16 = vld [vmem:[%s801_s1 + $0x8] sm:$0xff]  ;;  %v701_v18 = vld [vmem:[%s801_s1 + $0x10] sm:$0xff]  ;;  %v605_v59 = vmov 1966171168  }
   0xb   :  { %112 = vmatpush1.msra.mxu0 %v33_v12  ;;  %v32_v17 = vld [vmem:[#allocation2] sm:$0x1]  ;;  %v709_v19 = vld [vmem:[%s801_s1 + $0x18] sm:$0x3f]  ;;  %v530_v50 = vld [vmem:[%s800_s0 + $0x70] sm:$0x3f]  ;;  %v271_v60 = vunpack.c.l.s4 %v605_v59 }
   0xc   :  { %517 = vmatmul.mubr.msk.f32.vlgmr.msra.gmra.mxu0 %vm61_vm1, %v678_v13  ;;  %43 = vperm.xlu1 %548, %v27_v14   ;;  %v735_v47 = vld [vmem:[%s803_s3] sm:$0x1]  ;;  %v531_v48 = vld [vmem:[%s800_s0 + $0x78] sm:$0x3f]  ;;  %v529_v51 = vld [vmem:[%s800_s0 + $0x68] sm:$0xff]  ;;  %v184_v58 = vshrl.u32 %v183_v57, 7 }
   0xd   :  { %151 = vmatprep.mubr.f32.mxu0 %v603_v6  ;;  %53 = vperm.xlu0 %547, %v29_v15   ;;  %v528_v52 = vld [vmem:[%s800_s0 + $0x60] sm:$0xff]  ;;  %v527_v53 = vld [vmem:[%s800_s0 + $0x58] sm:$0xff]  ;;  %v526_v54 = vld [vmem:[%s800_s0 + $0x50] sm:$0xff]  ;;  %v272_v63 = vunpack.c.0.s8 %v271_v60  ;;  %vm777_vm2 = vcmp.lt.s32.totalorder %v183_v57, 256 }
   0xe   :  { %v525_v55 = vld [vmem:[%s800_s0 + $0x48] sm:$0xff]  ;;  %v524_v56 = vld [vmem:[%s800_s0 + $0x40] sm:$0xff]  ;;  %v185_v61 = vsub.s32 0, %v184_v58  ;;  %s606_s0 = smov [#allocation3]  }
   0xf   :  { %v275_v3 = vsub.s32 %v272_v63, %v184_v58  ;;  %s504_s15 = sshll.u32 %s606_s0, 4  ;;  %s505_s15 = int_to_ptr.vmem [resolvable:$true] %s504_s15 }
  0x10   :  { %518 = vmatmul.mubr.msk.f32.gmra.mxu0 %vm61_vm1, %v693_v16  ;;  %s581_s16 = scalar_lea.vmem %s505_s15, 64  ;;  %p586_p1 = scmp.lt.s32.totalorder %s505_s15, %s505_s15 }
  0x11   :  { %157 = vmatprep.mubr.f32.mxu0 %v603_v6  ;;  %180 = vperm.xlu0 %547, %v32_v17   ;;  %p582_p0 = scmp.ne.s32.totalorder %s505_s15, %s581_s16  ;;  %p587_p2 = scmp.lt.s32.totalorder %s581_s16, %s581_s16 }
  0x13   :  { %p588_p3 = por %p587_p2, %p586_p1 }
  0x14   :  { %519 = vmatmul.mubr.msk.f32.gmra.mxu0 %vm61_vm1, %v701_v18 }
  0x15   :  { %163 = vmatprep.mubr.f32.mxu0 %v603_v6  ;;  %p589_p4 = pnand %p588_p3, %p582_p0 }
  0x18   :  { %520 = vmatmul.mubr.msk.f32.gmra.mxu0 %vm61_vm1, %v709_v19 }
  0x19   :  { %472 = vmatprep.mubr.f32.mxu0 %v603_v6 }
  0x83   :  { %v716_v27 = vpop.permute.xlu1 %48 }
  0x84   :  { %v714_v24 = vpop.permute.xlu0 %58 }
  0x87   :  { %v724_v35 = vpop.permute.xlu1 %43 }
  0x88   :  { %v718_v29 = vpop.permute.xlu0 %53 }
  0x8c   :  { %v181_v62 = vpop.permute.xlu0 %180 }
  0x8d   :  { %v186_v1 = vrot.slane %v181_v62, %v185_v61 }
  0xcc   :  { %v147_v20 = vpop.f32.mrf.mxu0 }
  0xcd   :  { %v148_v39 = vadd.f32 %v147_v20, %v724_v35 }
  0xce   :  { %v149_v21 = vpop.f32.mrf.mxu0 }
  0xcf   :  { %v150_v38 = vadd.f32 %v149_v21, %v724_v35 }
  0xd0   :  { %v153_v22 = vpop.f32.mrf.mxu0 }
  0xd1   :  { %v154_v37 = vadd.f32 %v153_v22, %v716_v27 }
  0xd2   :  { %v155_v23 = vpop.f32.mrf.mxu0 }
  0xd3   :  { %v156_v36 = vadd.f32 %v155_v23, %v716_v27 }
  0xd4   :  { %v159_v25 = vpop.f32.mrf.mxu0 }
  0xd5   :  { %v160_v34 = vadd.f32 %v159_v25, %v718_v29 }
  0xd6   :  { %v161_v26 = vpop.f32.mrf.mxu0 }
  0xd7   :  { %v162_v32 = vadd.f32 %v161_v26, %v718_v29 }
  0xd8   :  { %v165_v28 = vpop.f32.mrf.mxu0 }
  0xd9   :  { %v166_v30 = vadd.f32 %v165_v28, %v714_v24 }
  0xda   :  { %v167_v31 = vpop.f32.mrf.mxu0 }
  0xdb   :  { %v168_v33 = vadd.f32 %v167_v31, %v714_v24 }
  0xdd   :  { %549 = vtanh.f32 %v168_v33 }
  0xde   :  { %551 = vtanh.f32 %v166_v30 }
  0xdf   :  { %553 = vtanh.f32 %v162_v32 }
  0xe0   :  { %555 = vtanh.f32 %v160_v34 }
  0xe1   :  { %557 = vtanh.f32 %v156_v36 }
  0xe2   :  { %559 = vtanh.f32 %v154_v37 }
  0xe3   :  { %561 = vtanh.f32 %v150_v38 }
  0xe4   :  { %563 = vtanh.f32 %v148_v39 }
  0xea   :  { %v550_v40 = vpop.eup %549 }
  0xeb   :  { %v552_v41 = vpop.eup %551  ;;  %521 = vmatprep.subr.msk.mxu1 %vm74_vm0, %v550_v40 }
  0xec   :  { %v554_v42 = vpop.eup %553  ;;  %522 = vmatpush1.msk.msra.mxu1 %vm74_vm0, %v552_v41 }
  0xed   :  { %v556_v43 = vpop.eup %555  ;;  %222 = vmatprep.subr.mxu1 %v554_v42 }
  0xee   :  { %v558_v44 = vpop.eup %557  ;;  %223 = vmatpush1.msra.mxu1 %v556_v43 }
  0xef   :  { %v560_v45 = vpop.eup %559  ;;  %224 = vmatprep.subr.mxu1 %v558_v44 }
  0xf0   :  { %v562_v46 = vpop.eup %561  ;;  %225 = vmatpush1.msra.mxu1 %v560_v45 }
  0xf1   :  { %v564_v49 = vpop.eup %563  ;;  %226 = vmatprep.subr.mxu1 %v562_v46 }
  0xf2   :  { %227 = vmatpush1.msra.mxu1 %v564_v49 }
  0xf3   :  { %523 = vmatmul.mubr.msk.f32.vlgmr.msra.gmra.mxu1 %vm61_vm1, %v735_v47  ;;  %532 = vmatprep.subr.msk.mxu1 %vm74_vm0, %v531_v48 }
  0xf4   :  { %533 = vmatpush1.msk.msra.mxu1 %vm74_vm0, %v530_v50  ;;  %369 = vmatprep.mubr.f32.mxu1 %v603_v6 }
  0xf5   :  { %331 = vmatprep.subr.mxu1 %v529_v51 }
  0xf6   :  { %332 = vmatpush1.msra.mxu1 %v528_v52 }
  0xf7   :  { %333 = vmatprep.subr.mxu1 %v527_v53 }
  0xf8   :  { %334 = vmatpush1.msra.mxu1 %v526_v54 }
  0xf9   :  { %335 = vmatprep.subr.mxu1 %v525_v55 }
  0xfa   :  { %336 = vmatpush1.msra.mxu1 %v524_v56 }
  0xfb   :  { %534 = vmatmul.mubr.msk.f32.vlgmr.msra.gmra.mxu1 %vm61_vm1, %v678_v13 }
  0xfc   :  { %375 = vmatprep.mubr.f32.mxu1 %v603_v6 }
  0xff   :  { %535 = vmatmul.mubr.msk.f32.gmra.mxu1 %vm61_vm1, %v693_v16 }
 0x100   :  { %381 = vmatprep.mubr.f32.mxu1 %v603_v6 }
 0x103   :  { %536 = vmatmul.mubr.msk.f32.gmra.mxu1 %vm61_vm1, %v701_v18 }
 0x104   :  { %387 = vmatprep.mubr.f32.mxu1 %v603_v6 }
 0x107   :  { %537 = vmatmul.mubr.msk.f32.gmra.mxu1 %vm61_vm1, %v709_v19 }
 0x1b3   :  { %v262_v0 = vpop.f32.mrf.mxu1 }
 0x1b4   :  { %v263_v4 = vadd.f32 %v262_v0, %v186_v1 }
 0x1b5   :  { %v264_v2 = vpop.f32.mrf.mxu1 }
 0x1b6   :  { %v265_v5 = vadd.f32 %v264_v2, %v186_v1 }
 0x1b8   :  { %v269_v7 = vcombine.low %v263_v4, %v265_v5 }
 0x1ba   :  { %v276_v8 = vrot.slane %v269_v7, %v275_v3 }
 0x1bb   :  { %v371_v9 = vpop.f32.mrf.mxu1 }
 0x1bc   :  { %v283_v10 = vrot.slane %v276_v8, %v275_v3  ;;  %v372_v26 = vadd.f32 %v371_v9, %v724_v35 }
 0x1bd   :  { %v373_v11 = vpop.f32.mrf.mxu1 }
 0x1be   :  { %289 = vst.msk [vmem:[#allocation3] sm:$0x3] %vm777_vm2, %v283_v10  ;;  %v374_v25 = vadd.f32 %v373_v11, %v724_v35 }
 0x1bf   :  { %v377_v12 = vpop.f32.mrf.mxu1 }
 0x1c0   :  { %v378_v23 = vadd.f32 %v377_v12, %v716_v27 }
 0x1c1   :  { %v379_v13 = vpop.f32.mrf.mxu1 }
 0x1c2   :  { %v380_v22 = vadd.f32 %v379_v13, %v716_v27 }
 0x1c3   :  { %v383_v14 = vpop.f32.mrf.mxu1 }
 0x1c4   :  { %v384_v21 = vadd.f32 %v383_v14, %v718_v29 }
 0x1c5   :  { %v385_v15 = vpop.f32.mrf.mxu1 }
 0x1c6   :  { %v386_v19 = vadd.f32 %v385_v15, %v718_v29 }
 0x1c7   :  { %v389_v16 = vpop.f32.mrf.mxu1 }
 0x1c8   :  { %v390_v17 = vadd.f32 %v389_v16, %v714_v24 }
 0x1c9   :  { %v391_v18 = vpop.f32.mrf.mxu1 }
 0x1ca   :  { %v392_v20 = vadd.f32 %v391_v18, %v714_v24 }
 0x1cc   :  { %565 = vtanh.f32 %v392_v20 }
 0x1cd   :  { %567 = vtanh.f32 %v390_v17 }
 0x1ce   :  { %569 = vtanh.f32 %v386_v19 }
 0x1cf   :  { %571 = vtanh.f32 %v384_v21 }
 0x1d0   :  { %573 = vtanh.f32 %v380_v22 }
 0x1d1   :  { %575 = vtanh.f32 %v378_v23 }
 0x1d2   :  { %577 = vtanh.f32 %v374_v25 }
 0x1d3   :  { %579 = vtanh.f32 %v372_v26 }
 0x1d9   :  { %v566_v28 = vpop.eup %565 }
 0x1da   :  { %v568_v24 = vpop.eup %567  ;;  %538 = vmatprep.subr.msk.mxu0 %vm74_vm0, %v566_v28 }
 0x1db   :  { %v570_v29 = vpop.eup %569  ;;  %539 = vmatpush1.msk.msra.mxu0 %vm74_vm0, %v568_v24 }
 0x1dc   :  { %v572_v30 = vpop.eup %571  ;;  %434 = vmatprep.subr.mxu0 %v570_v29 }
 0x1dd   :  { %v574_v27 = vpop.eup %573  ;;  %435 = vmatpush1.msra.mxu0 %v572_v30 }
 0x1de   :  { %v576_v31 = vpop.eup %575  ;;  %436 = vmatprep.subr.mxu0 %v574_v27 }
 0x1df   :  { %v578_v32 = vpop.eup %577  ;;  %437 = vmatpush1.msra.mxu0 %v576_v31 }
 0x1e0   :  { %v580_v33 = vpop.eup %579  ;;  %438 = vmatprep.subr.mxu0 %v578_v32 }
 0x1e1   :  { %439 = vmatpush1.msra.mxu0 %v580_v33 }
 0x1e2   :  { %540 = vmatmul.mubr.msk.f32.vlgmr.msra.gmra.mxu0 %vm61_vm1, %v735_v47 }
 0x2a2   :  { %v474_v34 = vpop.f32.mrf.mxu0 }
 0x2a3   :  { %v475_v36 = vadd.f32 %v474_v34, %v186_v1 }
 0x2a4   :  { %v476_v35 = vpop.f32.mrf.mxu0 }
 0x2a5   :  { %v477_v37 = vadd.f32 %v476_v35, %v186_v1 }
 0x2a7   :  { %v481_v38 = vcombine.low %v475_v36, %v477_v37 }
 0x2a9   :  { %v488_v39 = vrot.slane %v481_v38, %v275_v3 }
 0x2ab   :  { %v495_v40 = vrot.slane %v488_v39, %v275_v3 }
 0x2ad   :  { %498 = vst.msk [vmem:[#allocation3 + $0x2] sm:$0x3] %vm777_vm2, %v495_v40 }
 0x2ae   :  { %592 = shalt.err (!%p589_p4)
}
 0x2af   :  { %s607_s17 = smov 32   ;;  %s608_s18 = smov 2  }
 0x2b0   :  { %510 = dma.vmem_to_hbm [thread:$0]  %s505_s15, 64, %s805_s5, [#allocation4], %s607_s17, %s607_s17, %s608_s18  }
 0x2b1   :  { %601 = dma.done.wait [#allocation4], 64  }
 0x2b2   :  { %602 = vsyncadd [#allocation4], 4294967232 }
 0x2b3   :  { %514 = vsyncpa [#allocation4], 1 }

</bundles_post_ra>
